<compile_context>
chip_gen: v6e
topology: v6e:2x2x1
jax: 0.10.0
libtpu: 0.0.40
codegen_flags: <defaults>
</compile_context>

<pallas_src>
import functools
import math

import jax
import jax.numpy as jnp
from jax import lax
from jax.experimental import pallas as pl
from jax.experimental.pallas import tpu as pltpu


_VMEM_LIMIT = 48 * 1024 * 1024   # < v7x's 64 MiB physical VMEM, > v5e/v6e scoped defaults
_NEG_BIG = -1e30                 # finite "-inf" bias for padded KV columns


def _proj_kernel(x_ref, w_ref, o_ref):
    # x_ref: (1, 1, TS, H) bf16 (stacked q/k/v inputs)
    # w_ref: (1, H, H) bf16 pre-transposed to [in, out]; Wq already carries 1/sqrt(d_k)
    # o_ref: (1, 1, TS, H) bf16
    o_ref[0, 0] = jnp.dot(
        x_ref[0, 0], w_ref[0], preferred_element_type=jnp.float32
    ).astype(o_ref.dtype)


def _attn_kernel(q_ref, k_ref, v_ref, o_ref, m_ref, l_ref, acc_ref,
                 *, heads, d_k, tk, s_valid, needs_mask):
    # q_ref/k_ref/v_ref: (1, 1, T, H) bf16 blocks of the pre-projected (3, bs, Sp, H).
    # o_ref: (1, TQ, H).  m/l/acc: (TQ, H) f32 scratch — each head's running max /
    # running sum is broadcast across its d_k output columns so the final
    # normalize + store is a single lane-dense (TQ, H) elementwise op.
    kv = pl.program_id(2)

    @pl.when(kv == 0)
    def _init():
        m_ref[...] = jnp.full_like(m_ref, -jnp.inf)
        l_ref[...] = jnp.zeros_like(l_ref)
        acc_ref[...] = jnp.zeros_like(acc_ref)

    q = q_ref[0, 0]     # (TQ, H) bf16, softmax scale already folded into Wq
    kt = k_ref[0, 0]    # (TK, H) bf16
    vt = v_ref[0, 0]    # (TK, H) bf16

    if needs_mask:
        # Large negative bias on padded KV columns (position >= true S).
        col = kv * tk + lax.broadcasted_iota(jnp.int32, (1, tk), 1)
        pad_bias = jnp.where(col < s_valid, 0.0, _NEG_BIG).astype(jnp.float32)
    else:
        pad_bias = None

    # Static unroll over heads (d_k is not necessarily 128-aligned, so lane
    # slices must stay static; fori_loop over heads is only legal for d_k % 128 == 0).
    # TODO(synk): for d_k < 128 the per-head QK^T / PV matmuls underfill the
    #             256-wide MXU on v6e/v7x; folding head pairs per MXU call would help.
    for h in range(heads):
        lo, hi = h * d_k, (h + 1) * d_k
        # scores = q_h @ k_h^T via dot_general contracting the LAST dim of both
        # operands -> no per-head (TK, d_k) transpose on the XLU.
        s = lax.dot_general(q[:, lo:hi], kt[:, lo:hi],
                            (((1,), (1,)), ((), ())),
                            preferred_element_type=jnp.float32)        # (TQ, TK) f32
        if pad_bias is not None:
            s = s + pad_bias

        # Online (flash) softmax update for this head.
        m_old = m_ref[:, lo:hi]                                        # (TQ, d_k)
        m_new = jnp.maximum(m_old, jnp.max(s, axis=-1, keepdims=True)) # (TQ, d_k)
        m1 = m_new[:, 0:1]                                             # (TQ, 1)
        alpha = jnp.exp(m_old[:, 0:1] - m1)                            # (TQ, 1)
        p = jnp.exp(s - m1)                                            # (TQ, TK) f32
        l_ref[:, lo:hi] = alpha * l_ref[:, lo:hi] + jnp.sum(p, axis=-1, keepdims=True)
        acc_ref[:, lo:hi] = alpha * acc_ref[:, lo:hi] + jnp.dot(
            p.astype(jnp.bfloat16), vt[:, lo:hi],
            preferred_element_type=jnp.float32)
        m_ref[:, lo:hi] = m_new

    @pl.when(kv == pl.num_programs(2) - 1)
    def _finalize():
        # One lane-dense (TQ, H) store of the normalized output.
        inv_l = pl.reciprocal(l_ref[...], approx=True)
        o_ref[0] = (acc_ref[...] * inv_l).astype(o_ref.dtype)


def _round_up(x, m):
    return (x + m - 1) // m * m


def _pick_seq_tile(seq_len):
    # 256-wide tiles fill the 2x256 MXU on v6e/v7x and bound per-step VMEM to a
    # few MiB; short sequences use one 8/16-aligned tile (bf16 sublane packing).
    if seq_len >= 256:
        return 256
    if seq_len <= 8:
        return _round_up(max(seq_len, 1), 8)
    return _round_up(seq_len, 16)


def multi_head_attention(q, k, v, wq, wk, wv, heads):
    """q, k, v: (bs, S, H) float32; wq/wk/wv: (H, H) in PyTorch [out, in] layout."""
    bs, S, H = q.shape
    assert k.shape == (bs, S, H) and v.shape == (bs, S, H)
    assert H % heads == 0
    d_k = H // heads
    out_dtype = q.dtype  # keep module semantics (f32); bf16 output would halve writeback

    # Pre-transpose ([in, out]) and stack the projection weights; fold the
    # 1/sqrt(d_k) softmax scale into Wq so the attention kernel never rescales.
    # TODO(synk): for self-attention (q is k is v) the three projections could be a
    #             single (TS,H)@(H,3H) matmul; kept stacked to stay general (cross-attn).
    w_t = jnp.stack([wq.T * (1.0 / math.sqrt(d_k)), wk.T, wv.T], axis=0)
    w_t = w_t.astype(jnp.bfloat16)                                     # (3, H, H)

    tile = _pick_seq_tile(S)
    sp = _round_up(S, tile)
    needs_mask = sp != S

    x = jnp.stack([q, k, v], axis=0).astype(jnp.bfloat16)              # (3, bs, S, H)
    if needs_mask:
        x = jnp.pad(x, ((0, 0), (0, 0), (0, sp - S), (0, 0)))

    n_t = sp // tile

    # --- Pass 1: q/k/v projections, computed exactly once (no recompute per query tile).
    proj = pl.pallas_call(
        _proj_kernel,
        out_shape=jax.ShapeDtypeStruct((3, bs, sp, H), jnp.bfloat16),
        grid=(3, bs, n_t),
        in_specs=[
            pl.BlockSpec((1, 1, tile, H), lambda p, b, i: (p, b, i, 0)),
            # Weight block only changes with the outermost p axis -> 3 DMAs total.
            pl.BlockSpec((1, H, H), lambda p, b, i: (p, 0, 0)),
        ],
        out_specs=pl.BlockSpec((1, 1, tile, H), lambda p, b, i: (p, b, i, 0)),
        compiler_params=pltpu.CompilerParams(
            dimension_semantics=("parallel", "parallel", "parallel"),
            vmem_limit_bytes=_VMEM_LIMIT),
    )(x, w_t)

    # --- Pass 2: flash-style attention over KV tiles (online softmax).
    kernel = functools.partial(
        _attn_kernel, heads=heads, d_k=d_k, tk=tile, s_valid=S, needs_mask=needs_mask)

    # Same pre-projected array passed three times with different leading indices
    # (0=q, 1=k, 2=v) — avoids materializing separate qp/kp/vp slices in HBM.
    q_spec = pl.BlockSpec((1, 1, tile, H), lambda b, i, j: (0, b, i, 0))
    k_spec = pl.BlockSpec((1, 1, tile, H), lambda b, i, j: (1, b, j, 0))
    v_spec = pl.BlockSpec((1, 1, tile, H), lambda b, i, j: (2, b, j, 0))
    o_spec = pl.BlockSpec((1, tile, H), lambda b, i, j: (b, i, 0))

    out = pl.pallas_call(
        kernel,
        out_shape=jax.ShapeDtypeStruct((bs, sp, H), out_dtype),
        grid=(bs, n_t, n_t),
        in_specs=[q_spec, k_spec, v_spec],
        out_specs=o_spec,
        scratch_shapes=[pltpu.VMEM((tile, H), jnp.float32),   # m: running max
                        pltpu.VMEM((tile, H), jnp.float32),   # l: running sum
                        pltpu.VMEM((tile, H), jnp.float32)],  # acc: unnormalized out
        compiler_params=pltpu.CompilerParams(
            dimension_semantics=("parallel", "parallel", "arbitrary"),
            vmem_limit_bytes=_VMEM_LIMIT),
    )(proj, proj, proj)

    if needs_mask:
        out = out[:, :S, :]
    return out


def _reference(q, k, v, wq, wk, wv, heads):
    bs, S, H = q.shape
    d_k = H // heads

    def proj(x, w):
        y = x @ w.T                                                  # (bs, S, H)
        return y.reshape(bs, S, heads, d_k).transpose(0, 2, 1, 3)    # (bs, heads, S, d_k)

    qh, kh, vh = proj(q, wq), proj(k, wk), proj(v, wv)
    scores = jnp.einsum("bhqd,bhkd->bhqk", qh, kh) / math.sqrt(d_k)
    probs = jax.nn.softmax(scores, axis=-1)
    out = jnp.einsum("bhqk,bhkd->bhqd", probs, vh)
    return out.transpose(0, 2, 1, 3).reshape(bs, S, H)


if __name__ == "__main__":
    bs, S, H, heads = 2, 8, 32, 8

    key = jax.random.PRNGKey(0)
    kq, kk, kv, kwq, kwk, kwv = jax.random.split(key, 6)

    q = jax.random.normal(kq, (bs, S, H), dtype=jnp.float32)
    k = jax.random.normal(kk, (bs, S, H), dtype=jnp.float32)
    v = jax.random.normal(kv, (bs, S, H), dtype=jnp.float32)

    # deterministic synthetic nn.Linear weights, shape [out_features, in_features]
    bound = 1.0 / math.sqrt(H)
    wq = jax.random.uniform(kwq, (H, H), jnp.float32, -bound, bound)
    wk = jax.random.uniform(kwk, (H, H), jnp.float32, -bound, bound)
    wv = jax.random.uniform(kwv, (H, H), jnp.float32, -bound, bound)

    out = multi_head_attention(q, k, v, wq, wk, wv, heads)
    out = jax.block_until_ready(out)

    ref = _reference(q, k, v, wq, wk, wv, heads)
    assert out.shape == (bs, S, H)
    # bf16 matmul operands + approx reciprocal -> slightly looser tolerance than pure f32.
    assert jnp.allclose(out, ref, atol=3e-2, rtol=3e-2), "mismatch vs reference"

    print("KERNEL_OK")
</pallas_src>

<mosaic_0001>
module attributes {stable_mosaic.version = 11 : i64} {
  func.func @_proj_kernel(%arg0: i32, %arg1: i32, %arg2: i32, %arg3: memref<1x1x8x32xbf16, #tpu.memory_space<vmem>>, %arg4: memref<1x32x32xbf16, #tpu.memory_space<vmem>>, %arg5: memref<1x1x8x32xbf16, #tpu.memory_space<vmem>>) attributes {dimension_semantics = [#tpu.dimension_semantics<parallel>, #tpu.dimension_semantics<parallel>, #tpu.dimension_semantics<parallel>], iteration_bounds = array<i64: 3, 2, 1>, scalar_prefetch = 0 : i64, scratch_operands = 0 : i64, tpu.core_type = #tpu.core_type<tc>, window_params = [{transform_indices = @transform_0, window_bounds = array<i64: 1, 1, 8, 32>}, {transform_indices = @transform_1, window_bounds = array<i64: 1, 32, 32>}, {transform_indices = @transform_2, window_bounds = array<i64: 1, 1, 8, 32>}]} {
    %c0 = arith.constant 0 : index
    %c0_0 = arith.constant 0 : index
    %c0_1 = arith.constant 0 : index
    %c0_2 = arith.constant 0 : index
    %0 = vector.load %arg3[%c0, %c0_0, %c0_1, %c0_2] : memref<1x1x8x32xbf16, #tpu.memory_space<vmem>>, vector<1x1x8x32xbf16>
    %1 = vector.shape_cast %0 : vector<1x1x8x32xbf16> to vector<8x32xbf16>
    %c0_3 = arith.constant 0 : index
    %c0_4 = arith.constant 0 : index
    %c0_5 = arith.constant 0 : index
    %2 = vector.load %arg4[%c0_3, %c0_4, %c0_5] : memref<1x32x32xbf16, #tpu.memory_space<vmem>>, vector<1x32x32xbf16>
    %3 = vector.shape_cast %2 : vector<1x32x32xbf16> to vector<32x32xbf16>
    %cst = arith.constant dense<0.000000e+00> : vector<8x32xf32>
    %4 = tpu.matmul %1, %3, %cst {dimension_numbers = #tpu.dot_dimension_numbers<[1], [0], [0], [1], [0, 0, 1, 1], [], []>} : vector<8x32xbf16>, vector<32x32xbf16>, vector<8x32xf32> -> vector<8x32xf32>
    %5 = arith.truncf %4 : vector<8x32xf32> to vector<8x32xbf16>
    %c0_6 = arith.constant 0 : index
    %c0_7 = arith.constant 0 : index
    %c0_8 = arith.constant 0 : index
    %c0_9 = arith.constant 0 : index
    %6 = vector.load %arg5[%c0_6, %c0_7, %c0_8, %c0_9] : memref<1x1x8x32xbf16, #tpu.memory_space<vmem>>, vector<1x1x8x32xbf16>
    %7 = vector.shape_cast %6 : vector<1x1x8x32xbf16> to vector<8x32xbf16>
    %8 = vector.shape_cast %5 : vector<8x32xbf16> to vector<1x1x8x32xbf16>
    tpu.vector_store %arg5[%c0_6, %c0_7, %c0_8, %c0_9], %8 {strides = array<i32>} : memref<1x1x8x32xbf16, #tpu.memory_space<vmem>>, vector<1x1x8x32xbf16>,
    return
  }
  func.func @transform_0(%arg0: i32, %arg1: i32, %arg2: i32) -> (i32, i32, i32, i32) {
    %c0_i32 = arith.constant 0 : i32
    %c0_i32_0 = arith.constant 0 : i32
    return %arg0, %arg1, %arg2, %c0_i32 : i32, i32, i32, i32
  }
  func.func @transform_1(%arg0: i32, %arg1: i32, %arg2: i32) -> (i32, i32, i32) {
    %c0_i32 = arith.constant 0 : i32
    %c0_i32_0 = arith.constant 0 : i32
    %c0_i32_1 = arith.constant 0 : i32
    return %arg0, %c0_i32, %c0_i32_0 : i32, i32, i32
  }
  func.func @transform_2(%arg0: i32, %arg1: i32, %arg2: i32) -> (i32, i32, i32, i32) {
    %c0_i32 = arith.constant 0 : i32
    %c0_i32_0 = arith.constant 0 : i32
    return %arg0, %arg1, %arg2, %c0_i32 : i32, i32, i32, i32
  }
}

</mosaic_0001>

<bundles_post_ra>
// kernel: tpu_custom_call.1
= control target key start
LH: loop header
LB: loop body
LE: loop exit
PB: predicated region body
PF: predicated region fallthrough
CT: control target
= control target key end

     0   :  { %s1033_s0 = inlined_call_operand.hbm [shape: bf16[3,2,8,32], index: 0, kind: input, shape index: {}]   ;;  %s1034_s1 = inlined_call_operand.hbm [shape: bf16[3,32,32], index: 1, kind: input, shape index: {}]   ;;  %s1035_s2 = inlined_call_operand.hbm [shape: bf16[3,2,8,32], index: 2, kind: output, shape index: {}]  }
   0x1   :  { %1041 = sst [smem:[#allocation15_spill]] %s1033_s0 }
   0x2   :  { %7 = vsyncpa [#allocation3], 0 }
   0x3   :  { %9 = vsyncpa [#allocation3 + $0x1], 0 }
   0x4   :  { %10 = vsyncpa [#allocation6], 0 }
   0x5   :  { %12 = vsyncpa [#allocation6 + $0x1], 0 }
   0x6   :  { %13 = vsyncpa [#allocation4], 0 }
   0x7   :  { %15 = vsyncpa [#allocation4 + $0x1], 0  ;;  %s775_s9 = smov 0   ;;  %s777_s10 = smov 0  }
   0x8   :  { %s779_s11 = smov 0   ;;  %s781_s12 = smov 0  }
   0x9   :  { %s783_s13 = smov 0   ;;  %s785_s14 = smov 0  }
   0xa   :  { %s787_s15 = smov 0   ;;  %s789_s16 = smov 0  }
   0xb   :  { %s791_s17 = smov 0   ;;  %s793_s18 = smov 0  }
   0xc   :  { %s795_s19 = smov 0  }
   0xd LB: > { %1042 = sst [smem:[#allocation11_spill]] %s731_s14  ;;  %s424_s20 = sadd.s32 4294967295, %s751_s19   ;;  %s751_s19 = sphi %s795_s19, %s21_s19   ;;  %s747_s18 = sphi %s793_s18, %s1072_s18   ;;  %s743_s17 = sphi %s791_s17, %s1071_s17   ;;  %s739_s16 = sphi %s789_s16, %s1070_s16   ;;  %s735_s15 = sphi %s787_s15, %s1069_s15   ;;  %s731_s14 = sphi %s785_s14, %s1061_s14   ;;  %s727_s13 = sphi %s783_s13, %s1068_s13   ;;  %s723_s12 = sphi %s781_s12, %s1067_s12   ;;  %s719_s11 = sphi %s779_s11, %s1066_s11   ;;  %s715_s10 = sphi %s777_s10, %s1065_s10   ;;  %s711_s9 = sphi %s775_s9, %s1064_s9  }
   0xe   : > { %s425_s21 = sadd.s32 4294967294, %s751_s19   ;;  %s36_s22 = sadd.s32 1, %s743_s17 }
   0xf   : > { %s40_s23 = sadd.s32 1, %s747_s18  ;;  %p38_p0 = scmp.ge.s32.totalorder %s36_s22, 2 }
  0x10   : > { %s51_s24 = sadd.s32 1, %s731_s14  ;;  %p58_p1 = scmp.ne.s32.totalorder %s731_s14, %s727_s13 }
  0x11   : > { %p59_p2 = scmp.eq.s32.totalorder %s751_s19, 0  ;;  %s1074_s22 = smov (%p38_p0, %s36_s22), 0 }
  0x12   : > { %1043 = sst [smem:[#allocation12_spill]] %s1074_s22  ;;  %s1076_s23 = smov (!%p38_p0, %s40_s23), %s747_s18 }
  0x13   : > { %s45_s25 = ssub.s32 %s743_s17, %s1074_s22  ;;  %p848_p3 = por %p59_p2, %p58_p1 }
  0x14   : > { %p42_p4 = scmp.ge.s32.totalorder %s1076_s23, 3  ;;  %p64_p5 = scmp.ne.s32.totalorder %s727_s13, %s723_s12 }
  0x15   : > { %p854_p6 = scmp.eq.s32.totalorder %s424_s20, 0  ;;  %s77_s28 = sadd.s32 1, %s719_s11 }
  0x16   : > { %s1078_s23 = smov (%p42_p4, %s1076_s23), 0  ;;  %p84_p8 = scmp.ne.s32.totalorder %s719_s11, %s715_s10 }
  0x17   : > { %1046 = sst [smem:[#allocation13_spill]] %s1078_s23  ;;  %p866_p7 = por %p854_p6, %p64_p5 }
  0x18   : > { %s44_s30 = ssub.s32 %s747_s18, %s1078_s23  ;;  %p90_p9 = scmp.ne.s32.totalorder %s715_s10, %s711_s9 }
  0x19   : > { %s46_s3 = sor.u32 %s45_s25, %s44_s30  ;;  %p75_p10 = scmp.eq.s32.totalorder %s44_s30, 0 }
  0x1a   : > { %p49_p11 = scmp.eq.s32.totalorder %s46_s3, 0  ;;  %p878_p12 = por %p84_p8, %p59_p2 }
  0x1b   : > { %s883_s5 = scalar_select %p75_p10, %s719_s11, %s77_s28  }
  0x1c   : > { %s886_s6 = scalar_select %p49_p11, %s731_s14, %s51_s24  }
  0x1d   : > { %p890_p13 = por %p90_p9, %p854_p6  ;;  %p118_p0 = scmp.eq.s32.totalorder %s424_s20, 5 }
  0x1e   : > { %1049 = sst [smem:[#allocation14_spill]] %s886_s6  ;;  %p124_p4 = scmp.eq.s32.totalorder %s425_s21, 5 }
  0x1f   : > { %s1050_s7 = scalar_select %p890_p13, 1, 0 }
  0x20   : > { %p897_p2 = por %p118_p0, %p58_p1  ;;  %p475_p8 = scmp.lt.s32.totalorder %s751_s19, 6 }
  0x21   : > { %p905_p10 = por %p124_p4, %p64_p5  ;;  %s144_s24 = sand.u32 1, %s731_s14  }
  0x22   : > { %s1051_s8 = scalar_select %p897_p2, 1, 0 }
  0x23   : > { %s1052_s9 = scalar_select %p905_p10, 1, 0 }
  0x24   : > { %s428_s25 = sshll.u32 %s144_s24, 2  ;;  %s429_s27 = sshll.u32 %s747_s18, 1 }
  0x25   : > { %s154_s28 = sadd.s32 %s743_s17, %s429_s27  ;;  %s148_s30 = scalar_lea.vmem [#allocation2], %s428_s25 }
  0x26   : > { %s158_s20 = sshll.u32 %s148_s30, 4  ;;  %s430_s3 = sshll.u32 %s154_s28, 6  ;;  %s159_s20 = int_to_ptr.vmem [resolvable:$true] %s158_s20 }
  0x27   : > { %s1053_s0 = sld [smem:[#allocation15_spill]]  ;;  %p917_p1 = pnand %p475_p8, %p848_p3 }
  0x28   : > { %p923_p5 = pnand %p475_p8, %p878_p12  ;;  %p434_p6 = scmp.ge.s32.totalorder %s751_s19, 1 }
  0x29   : > { %p184_p9 = scmp.lt.s32.totalorder %s751_s19, 7  ;;  %s145_s25 = scalar_lea.sflag [#allocation3], %s144_s24 }
  0x2a   : > { %p573_p11 = pneg %p917_p1  ;;  %s584_s27 = scalar_lea.vmem %s159_s20, 64 }
  0x2b   : > { %p585_p0 = scmp.ne.s32.totalorder %s159_s20, %s584_s27  ;;  %s753_s23 = smov [#allocation2]  }
  0x2c   : > { %s589_s26 = sshll.u32 %s753_s23, 4  ;;  %s590_s26 = int_to_ptr.vmem [resolvable:$false] %s589_s26 }
  0x2d   : > { %s156_s22 = scalar_lea.hbm %s1053_s0, %s430_s3  ;;  %p587_p4 = pnand %p585_p0, %p573_p11 }
  0x2e   : > { %s591_s28 = scalar_lea.vmem %s590_s26, 128  ;;  %p592_p3 = scmp.lt.s32.totalorder %s159_s20, %s590_s26 }
  0x2f   : > { %p588_p10 = pneg %p587_p4  ;;  %p593_p2 = scmp.lt.s32.totalorder %s591_s28, %s584_s27 }
  0x31   : > { %p594_p13 = por %p593_p2, %p592_p3 }
  0x33   : > { %p595_p12 = pnand %p594_p13, %p588_p10 }
  0x35   : > { %598 = shalt.err (!%p595_p12)
}
  0x36   : > { %467 = dma.hbm_to_vmem [thread:$0]  (!%p917_p1), %s156_s22, 64, %s159_s20, %s145_s25  }
  0x37   : > { %p937_p8 = pnand %p434_p6, %p184_p9  ;;  %s165_s24 = sand.u32 1, %s719_s11  }
  0x38   : > { %s446_s30 = sshll.u32 %s747_s18, 8  ;;  %s431_s3 = sshll.u32 %s165_s24, 4 }
  0x39   : > { %s175_s23 = scalar_lea.hbm %s1034_s1, %s446_s30  ;;  %s169_s6 = scalar_lea.vmem [#allocation5], %s431_s3 }
  0x3a   : > { %s176_s26 = sshll.u32 %s169_s6, 4  ;;  %s166_s28 = scalar_lea.sflag [#allocation6], %s165_s24  ;;  %s177_s26 = int_to_ptr.vmem [resolvable:$true] %s176_s26 }
  0x3b   : > { %p601_p13 = pneg %p923_p5  ;;  %s612_s22 = scalar_lea.vmem %s177_s26, 256 }
  0x3c   : > { %p613_p2 = scmp.ne.s32.totalorder %s177_s26, %s612_s22  ;;  %s754_s20 = smov [#allocation5]  }
  0x3d   : > { %s617_s25 = sshll.u32 %s754_s20, 4  ;;  %s618_s25 = int_to_ptr.vmem [resolvable:$false] %s617_s25 }
  0x3e   : > { %p615_p10 = pnand %p613_p2, %p601_p13  ;;  %s619_s0 = scalar_lea.vmem %s618_s25, 512 }
  0x3f   : > { %p620_p6 = scmp.lt.s32.totalorder %s177_s26, %s618_s25  ;;  %p621_p9 = scmp.lt.s32.totalorder %s619_s0, %s612_s22 }
  0x40   : > { %p616_p1 = pneg %p615_p10 }
  0x41   : > { %p622_p11 = por %p621_p9, %p620_p6 }
  0x43   : > { %p623_p0 = pnand %p622_p11, %p616_p1 }
  0x45   : > { %626 = shalt.err (!%p623_p0)
}
  0x46   : > { %s755_s30 = smov 64   ;;  %s756_s3 = smov 4  }
  0x47   : > { %470 = dma.hbm_to_vmem [thread:$0]  (!%p923_p5), %s175_s23, 256, %s177_s26, %s166_s28, %s755_s30, %s755_s30, %s756_s3  }
  0x48   : > { %188 = sbr.rel (%p937_p8) target bundleno = 300 (0x12c), region = 28  ;;  %s953_s24 = sand.u32 (!%p937_p8), 1, %s727_s13  }
  0x49   : > { %s435_s21 = sshll.u32 (!%p937_p8), %s953_s24, 2  ;;  %s191_s27 = scalar_lea.sflag (!%p937_p8), [#allocation3], %s953_s24 }
  0x4a   : > { %s194_s0 = scalar_lea.vmem (!%p937_p8), [#allocation2], %s435_s21 }
  0x4d   : > { %698 = dma.done.wait (%p866_p7), %s191_s27, 64  }
  0x4e   : > { %700 = vsyncadd (%p866_p7), %s191_s27, 4294967232  ;;  %s199_s14 = sand.u32 1, %s715_s10   ;;  %p1057_p5 = scmp.ne.s32.totalorder %s1050_s7, 0 }
  0x4f   : > { %s436_s23 = sshll.u32 %s199_s14, 4  ;;  %s200_s4 = scalar_lea.sflag [#allocation6], %s199_s14 }
  0x50   : > { %s203_s6 = scalar_lea.vmem [#allocation5], %s436_s23 }
  0x51   : > { %702 = dma.done.wait (%p1057_p5), %s200_s4, 256  }
  0x52   : > { %704 = vsyncadd (%p1057_p5), %s200_s4, 4294967040  ;;  %v757_v0 = vmov 0.0   ;;  %vm758_vm0 = vmmov 0   ;;  %v569_v1 = vld [vmem:[%s203_s6 + $0x8] sm:$0xff]   ;;  %v570_v2 = vld [vmem:[%s203_s6] sm:$0xff]   ;;  %vm247_vm1 = vcmask 261120  }
  0x53   : > { %450 = vmatprep.subr.bf16.mxu0 %v757_v0  ;;  %454 = vmatprep.mubr.msk.bf16.mxu0 %vm758_vm0, %v757_v0  ;;  %v230_v3 = vld [vmem:[%s194_s0] sm:$0xf]  ;;  %s442_s29 = sshll.u32 %s739_s16, 1  ;;  %s228_s28 = scalar_lea.vmem [#allocation7], %s435_s21  ;;  %vm292_vm2 = vcmask 257024  }
  0x54   : > { %451 = vmatpush3.bf16.msra.mxu0 %v569_v1  ;;  %s307_s26 = sadd.s32 %s735_s15, %s442_s29  ;;  %s311_s22 = sshll.u32 %s228_s28, 4  ;;  %s973_s22 = int_to_ptr.vmem [resolvable:$true] %s311_s22 }
  0x55   : > { %452 = vmatprep.subr.bf16.mxu0 %v757_v0  ;;  %s443_s7 = sshll.u32 %s307_s26, 6  ;;  %s295_s15 = scalar_lea.sflag [#allocation4], %s953_s24 }
  0x56   : > { %s971_s30 = scalar_lea.hbm %s1035_s2, %s443_s7  ;;  %s627_s16 = scalar_lea.vmem %s973_s22, 64 }
  0x57   : > { %p628_p7 = scmp.ne.s32.totalorder %s973_s22, %s627_s16  ;;  %p1058_p4 = scmp.ne.s32.totalorder %s1051_s8, 0 }
  0x58   : > { %453 = vmatpush3.bf16.msra.mxu0 %v570_v2  ;;  %s759_s3 = smov [#allocation7]  }
  0x59   : > { %p629_p3 = pnand %p628_p7, %p1058_p4  ;;  %s631_s21 = sshll.u32 %s759_s3, 4  ;;  %s632_s21 = int_to_ptr.vmem [resolvable:$false] %s631_s21 }
  0x5a   : > { %s633_s27 = scalar_lea.vmem %s632_s21, 128  ;;  %p634_p8 = scmp.lt.s32.totalorder %s973_s22, %s632_s21 }
  0x5b   : > { %455 = vmatmul.mubr.msk.bf16.vlgmr.msra.gmra.mxu0 %vm247_vm1, %v230_v3  ;;  %p630_p12 = pneg %p629_p3  ;;  %p635_p13 = scmp.lt.s32.totalorder %s633_s27, %s627_s16 }
  0x5d   : > { %p636_p2 = por %p635_p13, %p634_p8 }
  0x5f   : > { %p637_p10 = pnand %p636_p2, %p630_p12 }
 0x11b   : > { %v285_v4 = vpop.f32.mrf.mxu0 }
 0x11c   : > { %v291_v5 = vpack.c.bf16 %v285_v4, %v285_v4 }
 0x11d   : > { %v456_v6 = vpop.f32.mrf.mxu0 }
 0x11e   : > { %293 = vst.msk [vmem:[%s228_s28] sm:$0xf] %vm292_vm2, %v291_v5 }
 0x11f   : > { %v288_v7 = vpop.f32.mrf.mxu0 }
 0x120   : > { %640 = shalt.err (!%p637_p10)
}
 0x121   : > { %s641_s0 = scalar_lea.hbm %s971_s30, 64  ;;  %s645_s23 = scalar_lea.hbm %s1035_s2, 384 }
 0x122   : > { %p642_p1 = scmp.ne.s32.totalorder %s971_s30, %s641_s0  ;;  %p646_p11 = scmp.lt.s32.totalorder %s971_s30, %s1035_s2 }
 0x123   : > { %p647_p0 = scmp.lt.s32.totalorder %s645_s23, %s641_s0 }
 0x124   : > { %p643_p6 = pnand %p642_p1, %p1058_p4 }
 0x125   : > { %p648_p5 = por %p647_p0, %p646_p11 }
 0x126   : > { %p644_p9 = pneg %p643_p6 }
 0x128   : > { %p649_p7 = pnand %p648_p5, %p644_p9 }
 0x12a   : > { %652 = shalt.err (!%p649_p7)
}
 0x12b   : > { %462 = dma.vmem_to_hbm [thread:$0]  (%p1058_p4), %s973_s22, 64, %s971_s30, %s295_s15   ;;  %v457_v8 = vpop.f32.mrf.mxu0 }
 0x12c PF: > { %p476_p3 = scmp.ge.s32.totalorder %s751_s19, 2  ;;  %s323_s29 = sand.u32 1, %s723_s12  }
 0x12d   : > { %p1059_p12 = scmp.ne.s32.totalorder %s1052_s9, 0  ;;  %s324_s26 = scalar_lea.sflag [#allocation4], %s323_s29 }
 0x12f   : > { %p472_p8 = pnand %p476_p3, %p1059_p12 }
 0x131   : > { %p473_p13 = pneg %p472_p8 }
 0x133   : > { %706 = dma.done.wait (%p473_p13), %s324_s26, 64  }
 0x134   : > { %708 = vsyncadd (%p473_p13), %s324_s26, 4294967232  ;;  %s21_s19 = sadd.s32 1, %s751_s19   ;;  %s1060_s8 = sld [smem:[#allocation11_spill]] }
 0x135   : > { %p18_p2 = scmp.ge.s32.totalorder %s21_s19, 8   ;;  %s1061_s14 = sld [smem:[#allocation14_spill]] }
 0x136   : > { %s1062_s7 = sld [smem:[#allocation12_spill]]  ;;  %s1064_s9 = smov %s715_s10 }
 0x137   : > { %s1063_s28 = sld [smem:[#allocation13_spill]]  ;;  %s1065_s10 = smov %s719_s11 }
 0x138   : > { %s1066_s11 = smov %s883_s5  ;;  %s1067_s12 = smov %s727_s13 }
 0x139   : > { %s1069_s15 = smov %s743_s17  ;;  %s1070_s16 = smov %s747_s18 }
 0x13a   : > { %s1068_s13 = smov %s1060_s8  ;;  %20 = sbr.rel (!%p18_p2) target bundleno = 13 (0xd), region = 86 }
 0x13c   : > { %s1071_s17 = smov %s1062_s7 }
 0x13d   : > { %s1072_s18 = smov %s1063_s28 }
 0x13f   :  { %329 = vsyncpa [#allocation3], 1 }
 0x140   :  { %331 = vsyncpa [#allocation3 + $0x1], 1 }
 0x141   :  { %332 = vsyncpa [#allocation6], 1 }
 0x142   :  { %334 = vsyncpa [#allocation6 + $0x1], 1 }
 0x143   :  { %335 = vsyncpa [#allocation4], 1 }
 0x144   :  { %337 = vsyncpa [#allocation4 + $0x1], 1 }

</bundles_post_ra>
